<compile_context>
chip_gen: v7x
topology: tpu7x:2x2x1
jax: 0.10.0
libtpu: 0.0.40
codegen_flags: <defaults>
</compile_context>

<pallas_src>
import jax
import jax.numpy as jnp
from jax.experimental import pallas as pl
from jax.experimental.pallas import tpu as pltpu

_N_SHOTS = 100
_LANE = 128


# ----------------------------------------------------------------------------
# Fused kernel:  y = x @ W + b   and   GHZ 100-shot measurement counts
# ----------------------------------------------------------------------------
def _fused_kernel(seed_ref, x_ref, w_ref, b_ref, o_ref, counts_ref):
    # ---- classical Linear layer (lane-dense padded output) ----
    # x_ref: [M, H]  w_ref: [H, O_pad]  b_ref: [1, O_pad]  o_ref: [M, O_pad]
    o_ref[...] = (
        jnp.dot(x_ref[...], w_ref[...], preferred_element_type=jnp.float32)
        + b_ref[...]
    ).astype(o_ref.dtype)

    # ---- GHZ circuit shot sampling ----
    # Measuring the 4-qubit GHZ state yields '0000' or '1111', each with p=1/2.
    # Draw 100 Bernoulli(1/2) shots from a splitmix32-style hash of
    # (seed, shot_index); use the top bit of the full 32-bit word.
    # TODO(synk): full Qiskit AerSimulator statevector simulation has no clean
    #             Pallas equivalent; only the GHZ measurement statistics are modeled.
    lane = jax.lax.broadcasted_iota(jnp.int32, (1, _LANE), 1)
    shot = lane.astype(jnp.uint32)
    h = seed_ref[0].astype(jnp.uint32) + shot * jnp.uint32(0x9E3779B9)
    h = h ^ (h >> jnp.uint32(16))
    h = h * jnp.uint32(0x85EBCA6B)
    h = h ^ (h >> jnp.uint32(13))
    h = h * jnp.uint32(0xC2B2AE35)
    h = h ^ (h >> jnp.uint32(16))
    outcome_one = ((h >> jnp.uint32(31)) & jnp.uint32(1)).astype(jnp.int32)

    valid = lane < _N_SHOTS                       # only the first 100 lanes count
    n_ones = jnp.sum(jnp.where(valid, outcome_one, 0))   # shots -> '1111'
    n_zeros = _N_SHOTS - n_ones                            # shots -> '0000'

    counts_ref[...] = jnp.where(lane == 0, n_zeros,
                                jnp.where(lane == 1, n_ones, 0))


def quantum_transformer_fused(x2d, w, b, seed):
    """x2d: [M, H] f32, w: [H, O] f32, b: [O] f32, seed: scalar int32."""
    M, H = x2d.shape
    O = w.shape[1]
    o_pad = max(_LANE, pl.cdiv(O, _LANE) * _LANE)

    # Pad output dim to a full 128-lane width (unmasked stores in the kernel).
    w_pad = jnp.zeros((H, o_pad), jnp.float32).at[:, :O].set(w.astype(jnp.float32))
    b_pad = jnp.zeros((1, o_pad), jnp.float32).at[:, :O].set(b.astype(jnp.float32))
    seed_arr = jnp.asarray(seed, dtype=jnp.int32).reshape(1)

    y_pad, counts = pl.pallas_call(
        _fused_kernel,
        out_shape=(
            jax.ShapeDtypeStruct((M, o_pad), jnp.float32),
            jax.ShapeDtypeStruct((1, _LANE), jnp.int32),
        ),
        in_specs=[
            pl.BlockSpec(memory_space=pltpu.MemorySpace.SMEM),  # seed scalar
            pl.BlockSpec(memory_space=pltpu.MemorySpace.VMEM),  # x2d
            pl.BlockSpec(memory_space=pltpu.MemorySpace.VMEM),  # w_pad
            pl.BlockSpec(memory_space=pltpu.MemorySpace.VMEM),  # b_pad
        ],
        out_specs=(
            pl.BlockSpec(memory_space=pltpu.MemorySpace.VMEM),  # classical out
            pl.BlockSpec(memory_space=pltpu.MemorySpace.VMEM),  # shot counts
        ),
    )(seed_arr, x2d, w_pad, b_pad)

    return counts[0, :2], y_pad[:, :O]


# ----------------------------------------------------------------------------
# QuantumTransformer forward
# ----------------------------------------------------------------------------
@jax.jit
def quantum_transformer_forward(x, w, b, seed):
    # classical layer -> (faithfully) ignored by the quantum stage, but returned
    # alongside the module's actual output (the two measurement counts).
    B, S, H = x.shape
    x2d = x.reshape(B * S, H)
    counts, classical_out = quantum_transformer_fused(x2d, w, b, seed)
    return counts, classical_out.reshape(B, S, -1)


if __name__ == "__main__":
    # config: hidden_size=32, output_size=16; x: [batch=2, seq=8, hidden=32]
    hidden_size, output_size = 32, 16
    batch, seq = 2, 8

    key = jax.random.PRNGKey(0)
    kx, kw, kb = jax.random.split(key, 3)

    x = jax.random.normal(kx, (batch, seq, hidden_size), dtype=jnp.float32)

    # deterministic nn.Linear-style init: U(-1/sqrt(in), 1/sqrt(in))
    bound = 1.0 / (hidden_size ** 0.5)
    w = jax.random.uniform(kw, (hidden_size, output_size), jnp.float32, -bound, bound)
    b = jax.random.uniform(kb, (output_size,), jnp.float32, -bound, bound)

    seed = jnp.int32(0)   # runtime scalar: no retrace/recompile per seed value
    result, classical_out = quantum_transformer_forward(x, w, b, seed)
    jax.block_until_ready(result)
    jax.block_until_ready(classical_out)

    # sanity: counts('0000') + counts('1111') == shots, shapes match the module
    assert result.shape == (2,)
    assert int(result[0]) + int(result[1]) == _N_SHOTS
    assert int(result[0]) >= 0 and int(result[1]) >= 0
    assert classical_out.shape == (batch, seq, output_size)

    # reference check for the classical Linear layer
    ref = x.reshape(-1, hidden_size) @ w + b
    assert jnp.allclose(classical_out.reshape(-1, output_size), ref, atol=1e-5)

    print("KERNEL_OK")
</pallas_src>

<mosaic_0001>
module attributes {stable_mosaic.version = 11 : i64} {
  func.func @_fused_kernel(%arg0: memref<1xi32, #tpu.memory_space<smem>>, %arg1: memref<16x32xf32, #tpu.memory_space<vmem>>, %arg2: memref<32x128xf32, #tpu.memory_space<vmem>>, %arg3: memref<1x128xf32, #tpu.memory_space<vmem>>, %arg4: memref<16x128xf32, #tpu.memory_space<vmem>>, %arg5: memref<1x128xi32, #tpu.memory_space<vmem>>) attributes {dimension_semantics = [], scalar_prefetch = 0 : i64, scratch_operands = 0 : i64, tpu.core_type = #tpu.core_type<tc>} {
    %c0 = arith.constant 0 : index
    %c0_0 = arith.constant 0 : index
    %0 = vector.load %arg1[%c0, %c0_0] : memref<16x32xf32, #tpu.memory_space<vmem>>, vector<16x32xf32>
    %c0_1 = arith.constant 0 : index
    %c0_2 = arith.constant 0 : index
    %1 = vector.load %arg2[%c0_1, %c0_2] : memref<32x128xf32, #tpu.memory_space<vmem>>, vector<32x128xf32>
    %cst = arith.constant dense<0.000000e+00> : vector<16x128xf32>
    %2 = tpu.matmul %0, %1, %cst {dimension_numbers = #tpu.dot_dimension_numbers<[1], [0], [0], [1], [0, 0, 1, 1], [], []>} : vector<16x32xf32>, vector<32x128xf32>, vector<16x128xf32> -> vector<16x128xf32>
    %c0_3 = arith.constant 0 : index
    %c0_4 = arith.constant 0 : index
    %3 = vector.load %arg3[%c0_3, %c0_4] : memref<1x128xf32, #tpu.memory_space<vmem>>, vector<1x128xf32>
    %4 = vector.broadcast %3 : vector<1x128xf32> to vector<16x128xf32>
    %5 = arith.addf %2, %4 : vector<16x128xf32>
    %c0_5 = arith.constant 0 : index
    %c0_6 = arith.constant 0 : index
    %6 = vector.load %arg4[%c0_5, %c0_6] : memref<16x128xf32, #tpu.memory_space<vmem>>, vector<16x128xf32>
    tpu.vector_store %arg4[%c0_5, %c0_6], %5 {strides = array<i32>} : memref<16x128xf32, #tpu.memory_space<vmem>>, vector<16x128xf32>,
    %7 = tpu.iota {dimensions = array<i32: 1>} : vector<1x128xi32>
    %c0_7 = arith.constant 0 : index
    %8 = memref.load %arg0[%c0_7] : memref<1xi32, #tpu.memory_space<smem>>
    %c-1640531527_i32 = arith.constant -1640531527 : i32
    %9 = vector.broadcast %c-1640531527_i32 : i32 to vector<1x128xi32>
    %10 = arith.muli %7, %9 : vector<1x128xi32>
    %11 = vector.broadcast %8 : i32 to vector<1x128xi32>
    %12 = arith.addi %11, %10 : vector<1x128xi32>
    %c16_i32 = arith.constant 16 : i32
    %13 = vector.broadcast %c16_i32 : i32 to vector<1x128xi32>
    %14 = arith.shrui %12, %13 : vector<1x128xi32>
    %15 = arith.xori %12, %14 : vector<1x128xi32>
    %c-2048144789_i32 = arith.constant -2048144789 : i32
    %16 = vector.broadcast %c-2048144789_i32 : i32 to vector<1x128xi32>
    %17 = arith.muli %15, %16 : vector<1x128xi32>
    %c13_i32 = arith.constant 13 : i32
    %18 = vector.broadcast %c13_i32 : i32 to vector<1x128xi32>
    %19 = arith.shrui %17, %18 : vector<1x128xi32>
    %20 = arith.xori %17, %19 : vector<1x128xi32>
    %c-1028477387_i32 = arith.constant -1028477387 : i32
    %21 = vector.broadcast %c-1028477387_i32 : i32 to vector<1x128xi32>
    %22 = arith.muli %20, %21 : vector<1x128xi32>
    %c16_i32_8 = arith.constant 16 : i32
    %23 = vector.broadcast %c16_i32_8 : i32 to vector<1x128xi32>
    %24 = arith.shrui %22, %23 : vector<1x128xi32>
    %25 = arith.xori %22, %24 : vector<1x128xi32>
    %c31_i32 = arith.constant 31 : i32
    %26 = vector.broadcast %c31_i32 : i32 to vector<1x128xi32>
    %27 = arith.shrui %25, %26 : vector<1x128xi32>
    %c1_i32 = arith.constant 1 : i32
    %28 = vector.broadcast %c1_i32 : i32 to vector<1x128xi32>
    %29 = arith.andi %27, %28 : vector<1x128xi32>
    %c100_i32 = arith.constant 100 : i32
    %30 = vector.broadcast %c100_i32 : i32 to vector<1x128xi32>
    %31 = arith.cmpi slt, %7, %30 : vector<1x128xi32>
    %c0_i32 = arith.constant 0 : i32
    %32 = vector.broadcast %c0_i32 : i32 to vector<1x128xi32>
    %33 = arith.select %31, %29, %32 : vector<1x128xi1>, vector<1x128xi32>
    %34 = vector.shape_cast %33 : vector<1x128xi32> to vector<1x1x128xi32>
    %cst_9 = arith.constant dense<0> : vector<1xi32>
    %35 = vector.multi_reduction <add>, %34, %cst_9 [1, 2] : vector<1x1x128xi32> to vector<1xi32>
    %36 = vector.shape_cast %35 : vector<1xi32> to vector<1x1x1xi32>
    %37 = vector.extract %36[0, 0, 0] : i32 from vector<1x1x1xi32>
    %c100_i32_10 = arith.constant 100 : i32
    %38 = arith.subi %c100_i32_10, %37 : i32
    %c0_i32_11 = arith.constant 0 : i32
    %39 = vector.broadcast %c0_i32_11 : i32 to vector<1x128xi32>
    %40 = arith.cmpi eq, %7, %39 : vector<1x128xi32>
    %c1_i32_12 = arith.constant 1 : i32
    %41 = vector.broadcast %c1_i32_12 : i32 to vector<1x128xi32>
    %42 = arith.cmpi eq, %7, %41 : vector<1x128xi32>
    %c0_i32_13 = arith.constant 0 : i32
    %43 = vector.broadcast %37 : i32 to vector<1x128xi32>
    %44 = vector.broadcast %c0_i32_13 : i32 to vector<1x128xi32>
    %45 = arith.select %42, %43, %44 : vector<1x128xi1>, vector<1x128xi32>
    %46 = vector.broadcast %38 : i32 to vector<1x128xi32>
    %47 = arith.select %40, %46, %45 : vector<1x128xi1>, vector<1x128xi32>
    %c0_14 = arith.constant 0 : index
    %c0_15 = arith.constant 0 : index
    %48 = vector.load %arg5[%c0_14, %c0_15] : memref<1x128xi32, #tpu.memory_space<vmem>>, vector<1x128xi32>
    tpu.vector_store %arg5[%c0_14, %c0_15], %47 {strides = array<i32>} : memref<1x128xi32, #tpu.memory_space<vmem>>, vector<1x128xi32>,
    return
  }
}

</mosaic_0001>

<bundles_post_ra>
// kernel: quantum_transformer_forward.1
= control target key start
LH: loop header
LB: loop body
LE: loop exit
PB: predicated region body
PF: predicated region fallthrough
CT: control target
= control target key end

     0   :  { %vm33_vm0 = vcmask 261120   ;;  %v117_v0 = vlaneseq  ;;  %s260_s2 = inlined_call_operand.vmem [shape: f32[32,128], index: 2, kind: input, shape index: {}]   ;;  %s261_s1 = inlined_call_operand.vmem [shape: f32[16,32], index: 1, kind: input, shape index: {}]   ;;  %s262_s0 = inlined_call_operand.<no memory space> [shape: s32[1], index: 0, kind: input, shape index: {}]   ;;  %s263_s3 = inlined_call_operand.vmem [shape: f32[1,128], index: 3, kind: input, shape index: {}]   ;;  %s264_s4 = inlined_call_operand.vmem [shape: f32[16,128], index: 4, kind: output, shape index: {0}]   ;;  %s265_s5 = inlined_call_operand.vmem [shape: s32[1,128], index: 5, kind: output, shape index: {1}]  }
   0x1   :  { %v22_v1 = vld [vmem:[%s260_s2] sm:$0xff]  ;;  %v23_v2 = vld [vmem:[%s260_s2 + $0x8] sm:$0xff]  ;;  %v24_v3 = vld [vmem:[%s260_s2 + $0x10] sm:$0xff]  ;;  %v121_v9 = vstv %s262_s0 }
   0x2   :  { %v185_v4 = vpack.c.bf16 %v23_v2, %v22_v1  ;;  %v25_v5 = vld [vmem:[%s260_s2 + $0x18] sm:$0xff]  ;;  %v20_v6 = vld [vmem:[%s261_s1] sm:$0xff]  ;;  %v118_v7 = vand.u32 127, %v117_v0  ;;  %v21_v13 = vld [vmem:[%s261_s1 + $0x8] sm:$0xff] }
   0x3   :  { %v189_v8 = vpack.c.bf16 %v25_v5, %v24_v3  ;;  %182 = vmatprep.mubr.msk.f32.mxu0 %vm33_vm0, %v20_v6  ;;  %v164_v33 = vld [vmem:[%s263_s3] ss:$0 sm:$0xff] }
   0x4   :  { %186 = vmatprep.subr.bf16.mxu0 %v185_v4  ;;  %v120_v10 = vmul.u32 2654435769, %v118_v7  ;;  %vm133_vm1 = vcmp.lt.s32.totalorder %v118_v7, 100  ;;  %vm150_vm2 = vcmp.eq.s32.totalorder %v118_v7, 1  ;;  %vm149_vm3 = vcmp.eq.s32.totalorder %v118_v7, 0 }
   0x5   :  { %188 = vmatpush3.bf16.msra.mxu0 %v185_v4 }
   0x6   :  { %190 = vmatprep.subr.bf16.mxu0 %v189_v8  ;;  %v122_v11 = vadd.s32 %v121_v9, %v120_v10 }
   0x8   :  { %v123_v12 = vshrl.u32 %v122_v11, 16 }
   0x9   :  { %192 = vmatpush3.bf16.msra.mxu0 %v189_v8 }
   0xa   :  { %v124_v14 = vxor.u32 %v123_v12, %v122_v11 }
   0xc   :  { %183 = vmatmul.mubr.msk.f32.vlgmr.msra.gmra.mrb[0].mxu0 %vm33_vm0, %v21_v13  ;;  %v125_v15 = vmul.u32 2246822507, %v124_v14 }
   0xe   :  { %v126_v16 = vshrl.u32 %v125_v15, 13 }
  0x10   :  { %v127_v17 = vxor.u32 %v126_v16, %v125_v15 }
  0x12   :  { %v128_v18 = vmul.u32 3266489909, %v127_v17 }
  0x14   :  { %v129_v19 = vshrl.u32 %v128_v18, 16 }
  0x16   :  { %v130_v20 = vxor.u32 %v129_v19, %v128_v18 }
  0x18   :  { %v167_v21 = vshrl.u32 %v130_v20, 31 }
  0x1a   :  { %v134_v22 = vsel %vm133_vm1, %v167_v21, 0 }
  0x1b   :  { %v136_v23 = vshrl.u32 %v134_v22, 16  ;;  %v135_v24 = vand.u32 65535, %v134_v22 }
  0x1d   :  { %v138_v25 = vcvt.s32.f32 %v136_v23  ;;  %v137_v26 = vcvt.s32.f32 %v135_v24 }
  0x1f   :  { %141 = vadd.xlane.f32.xlu0 %v138_v25 }
  0x23   :  { %139 = vadd.xlane.f32.xlu0 %v137_v26 }
  0xac   :  { %v142_v27 = vpop.xlane.xlu0 %141 }
  0xad   :  { %v144_v28 = vcvt.f32.s32 %v142_v27 }
  0xaf   :  { %v145_v30 = vshll.u32 %v144_v28, 16 }
  0xb0   :  { %v140_v29 = vpop.xlane.xlu0 %139 }
  0xb1   :  { %v143_v31 = vcvt.f32.s32 %v140_v29 }
  0xb3   :  { %v146_v32 = vadd.s32 %v145_v30, %v143_v31 }
  0xb5   :  { %193 = vpush %v146_v32 }
  0xdf   :  { %v184_v34 = vpop.f32.mrb[0].mxu0 }
  0xe0   :  { %v112_v35 = vadd.f32 %v184_v34, %v164_v33  ;;  %v106_v36 = vpop.f32.mrb[1].mxu0 }
  0xe1   :  { %v107_v37 = vadd.f32 %v164_v33, %v106_v36 }
  0xe2   :  { %116 = vst [vmem:[%s264_s4 + $0x8] sm:$0xff] %v112_v35 }
  0xe3   :  { %115 = vst [vmem:[%s264_s4] sm:$0xff] %v107_v37 }
  0xe6   :  { %s194_s10 = spop %193 }
  0xe7   :  { %s148_s11 = ssub.s32 100, %s194_s10  ;;  %v151_v38 = vstv %s194_s10 }
  0xe8   :  { %v152_v39 = vsel %vm150_vm2, %v151_v38, 0  ;;  %v153_v40 = vstv %s148_s11 }
  0xe9   :  { %v154_v41 = vsel %vm149_vm3, %v153_v40, %v152_v39 }
  0xea   :  { %155 = vst [vmem:[%s265_s5] sm:$0x1] %v154_v41 }

</bundles_post_ra>
